<compile_context>
chip_gen: v5e
topology: v5e:2x2
jax: 0.10.0
libtpu: 0.0.40
codegen_flags: <defaults>
</compile_context>

<pallas_src>
import jax
import jax.numpy as jnp
from jax.experimental import pallas as pl
from jax.experimental.pallas import tpu as pltpu


# ----------------------------------------------------------------------------
# Kernels.  Block shapes:
#   x_ref: (Nb, Cin,  T)   input block  (T = lane-dense spatial tile)
#   w_ref: (Cout, Cin)     resident weights (possibly bf16)
#   b_ref: (Cout, 1)       resident bias
#   o_ref: (Nb, Cout, T)   output block
# ----------------------------------------------------------------------------
def _final_stage_kernel_vpu(x_ref, w_ref, b_ref, o_ref):
    """Small-channel path: fused ReLU + 1x1 conv as unrolled VPU FMAs."""
    w = w_ref[...].astype(jnp.float32)          # (Cout, Cin)
    b = b_ref[...].astype(jnp.float32)          # (Cout, 1)
    nb, cin, _ = x_ref.shape
    for n in range(nb):                         # unrolled at trace time
        x = jnp.maximum(x_ref[n], 0.0).astype(jnp.float32)   # (Cin, T)
        # Outer-product accumulation: (Cout,1) * (1,T) broadcast FMAs.
        acc = w[:, 0:1] * x[0:1, :]
        for c in range(1, cin):                 # unrolled at trace time
            acc = acc + w[:, c:c + 1] * x[c:c + 1, :]
        o_ref[n] = (acc + b).astype(o_ref.dtype)


def _final_stage_kernel_mxu(x_ref, w_ref, b_ref, o_ref):
    """Large-channel path: fused ReLU + 1x1 conv as MXU matmuls (f32 accum)."""
    w = w_ref[...]                              # (Cout, Cin), possibly bf16
    b = b_ref[...].astype(jnp.float32)          # (Cout, 1)
    nb = x_ref.shape[0]
    for n in range(nb):                         # unrolled at trace time
        x = jnp.maximum(x_ref[n], 0.0).astype(w.dtype)        # (Cin, T)
        acc = jnp.dot(w, x, preferred_element_type=jnp.float32)   # (Cout, T)
        o_ref[n] = (acc + b).astype(o_ref.dtype)


# ----------------------------------------------------------------------------
# Wrapper
# ----------------------------------------------------------------------------
def _round_up(v, m):
    return ((v + m - 1) // m) * m


def _round_down(v, m):
    return (v // m) * m


def final_stage_forward(x_nchw, weight, bias, *, weight_compute_dtype=None):
    """x_nchw: (N, Cin, H, W)
       weight: (Cout, Cin)   -- PyTorch conv weight (Cout, Cin, 1, 1) squeezed
       bias:   (Cout,)
       returns (N, Cout, H, W), matching nn.Conv2d(1x1)(relu(x))."""
    N, Cin, H, W = x_nchw.shape
    Cout, wc = weight.shape
    assert wc == Cin
    HW = H * W
    x_item = jnp.dtype(x_nchw.dtype).itemsize

    small_channels = (Cin <= 32) and (Cout <= 32)
    kernel = _final_stage_kernel_vpu if small_channels else _final_stage_kernel_mxu

    # --- generation-aware VMEM budget (v5e/v6e: 128 MiB, v7x: 64 MiB/TC) -----
    try:
        vmem_cap = int(pltpu.get_tpu_info().vmem_capacity_bytes)
    except Exception:
        vmem_cap = 64 * 1024 * 1024                 # conservative (v7x per-TC)
    one_mib = 1024 * 1024
    budget = max(vmem_cap // 2 - 8 * one_mib, 16 * one_mib)     # tile budget
    limit_ceiling = max(min(vmem_cap * 5 // 8, vmem_cap - 16 * one_mib),
                        16 * one_mib)                           # vmem_limit cap

    # --- weight compute dtype: bf16 at ResNet-scale channels -----------------
    if weight_compute_dtype is None:
        if (not small_channels) and (Cin * Cout >= 512 * 512):
            weight_compute_dtype = jnp.bfloat16     # halves VMEM, 2-4x MXU tput
        else:
            weight_compute_dtype = weight.dtype
    w_used = weight.astype(weight_compute_dtype)
    b2 = bias.reshape(Cout, 1)

    w_item = jnp.dtype(w_used.dtype).itemsize
    b_item = jnp.dtype(b2.dtype).itemsize
    resident_bytes = Cin * Cout * w_item + Cout * b_item
    if (resident_bytes > (budget * 3) // 4) and (w_item > 2) and not small_channels:
        # Large-weight fallback: shrink the resident weight with bf16.
        w_used = weight.astype(jnp.bfloat16)
        w_item = 2
        resident_bytes = Cin * Cout * w_item + Cout * b_item
    # TODO(synk): add a Cin-split grid axis with an f32 VMEM accumulator for
    # weights that exceed the budget even in bf16 (Cin*Cout >~ 10^8 params).

    # --- spatial / batch tiling ----------------------------------------------
    per_col_bytes = 2 * (Cin + Cout) * x_item        # double-buffered x + out
    budget_cols = max((budget - resident_bytes) // per_col_bytes, 256)
    col_cap = int(min(budget_cols, 32768))           # lifted hard cap

    HW128 = _round_up(HW, 128)
    if HW128 <= col_cap:
        # Whole spatial extent fits one lane-dense tile: pack batch elements
        # per grid step to amortize the ~0.35 us fixed per-step cost.
        tile_hw = HW128
        grid_hw = 1
        nb = max(1, min(N, col_cap // tile_hw))
        if N >= 2:
            nb = min(nb, (N + 1) // 2)      # keep >=2 grid steps (v7x megacore)
        elif HW128 >= 256:
            tile_hw = _round_up(HW128 // 2, 128)     # N==1: split spatially
            grid_hw = 2
    else:
        nb = 1
        # 512-lane tiles keep the 2x256 MXUs (v6e/v7x) full and cut step count.
        align = 512 if col_cap >= 512 else 128
        tile_hw = max(128, _round_down(col_cap, align))
        grid_hw = pl.cdiv(HW, tile_hw)               # >= 2 by construction

    HW_pad = grid_hw * tile_hw
    N_grid = (N + nb - 1) // nb
    N_pad = N_grid * nb

    # Free view: NCHW is contiguous as (N, Cin, H*W).  Pad only ragged tails
    # (padded zeros -> relu 0 -> bias-only columns, sliced off afterwards).
    x3 = x_nchw.reshape(N, Cin, HW)
    if HW_pad != HW or N_pad != N:
        x3 = jnp.pad(x3, ((0, N_pad - N), (0, 0), (0, HW_pad - HW)))

    def _call(single_buffer_consts):
        const_kwargs = {}
        if single_buffer_consts:
            # Constant index_map -> never revisited; one buffer is enough.
            const_kwargs = dict(pipeline_mode=pl.Buffered(1))
        wbuf = 1 if single_buffer_consts else 2
        est = wbuf * resident_bytes + 2 * nb * tile_hw * (Cin + Cout) * x_item
        vmem_limit = int(min(limit_ceiling,
                             max(est + est // 4 + 2 * one_mib, 16 * one_mib)))
        return pl.pallas_call(
            kernel,
            out_shape=jax.ShapeDtypeStruct((N_pad, Cout, HW_pad), x_nchw.dtype),
            grid_spec=pltpu.PrefetchScalarGridSpec(
                num_scalar_prefetch=0,
                grid=(N_grid, grid_hw),
                in_specs=[
                    pl.BlockSpec((nb, Cin, tile_hw), lambda n, j: (n, 0, j)),
                    pl.BlockSpec((Cout, Cin), lambda n, j: (0, 0), **const_kwargs),
                    pl.BlockSpec((Cout, 1), lambda n, j: (0, 0), **const_kwargs),
                ],
                out_specs=pl.BlockSpec((nb, Cout, tile_hw), lambda n, j: (n, 0, j)),
            ),
            compiler_params=pltpu.CompilerParams(
                dimension_semantics=("parallel", "parallel"),
                vmem_limit_bytes=vmem_limit,
            ),
        )(x3, w_used, b2)

    try:
        out3 = _call(True)
    except Exception:
        # pipeline_mode=pl.Buffered(1) unsupported on this jax version ->
        # fall back to default double-buffered resident weight/bias.
        out3 = _call(False)

    out3 = out3[:N, :, :HW]
    return out3.reshape(N, Cout, H, W)


# ----------------------------------------------------------------------------
# Self-test
# ----------------------------------------------------------------------------
if __name__ == "__main__":
    def _ref(x, w, b):
        return (jnp.einsum("nchw,oc->nohw", jnp.maximum(x, 0.0), w)
                + b[None, :, None, None])

    # 1) Small-channel (VPU) path, shapes consistent with the module.
    k1, k2, k3 = jax.random.split(jax.random.PRNGKey(0), 3)
    N, Cin, Cout, H, W = 2, 4, 8, 16, 16
    x = jax.random.normal(k1, (N, Cin, H, W), dtype=jnp.float32)
    w = jax.random.normal(k2, (Cout, Cin), dtype=jnp.float32) * 0.1
    b = jax.random.normal(k3, (Cout,), dtype=jnp.float32) * 0.1
    out = jax.block_until_ready(final_stage_forward(x, w, b))
    assert out.shape == (N, Cout, H, W)
    assert jnp.allclose(out, _ref(x, w, b), atol=1e-5, rtol=1e-5)

    # 2) MXU path with f32 weights.
    k1, k2, k3 = jax.random.split(jax.random.PRNGKey(1), 3)
    N2, C2 = 2, 64
    x2 = jax.random.normal(k1, (N2, C2, 16, 16), dtype=jnp.float32)
    w2 = jax.random.normal(k2, (C2, C2), dtype=jnp.float32) * 0.05
    b2 = jax.random.normal(k3, (C2,), dtype=jnp.float32) * 0.05
    out2 = jax.block_until_ready(final_stage_forward(x2, w2, b2))
    assert jnp.allclose(out2, _ref(x2, w2, b2), atol=5e-3, rtol=5e-3)

    # 3) MXU path with bf16 weights + batch packing (nb > 1).
    k1, k2, k3 = jax.random.split(jax.random.PRNGKey(2), 3)
    N3, C3 = 4, 256
    x3 = jax.random.normal(k1, (N3, C3, 8, 8), dtype=jnp.float32)
    w3 = jax.random.normal(k2, (C3, C3), dtype=jnp.float32) * 0.05
    b3 = jax.random.normal(k3, (C3,), dtype=jnp.float32) * 0.05
    out3 = jax.block_until_ready(
        final_stage_forward(x3, w3, b3, weight_compute_dtype=jnp.bfloat16))
    assert jnp.allclose(out3, _ref(x3, w3, b3), atol=2e-2, rtol=2e-2)

    # 4) VPU path with batch packing (nb > 1) and ragged spatial padding.
    k1, k2, k3 = jax.random.split(jax.random.PRNGKey(3), 3)
    N4, Ci4, Co4 = 8, 4, 8
    x4 = jax.random.normal(k1, (N4, Ci4, 4, 4), dtype=jnp.float32)
    w4 = jax.random.normal(k2, (Co4, Ci4), dtype=jnp.float32) * 0.1
    b4 = jax.random.normal(k3, (Co4,), dtype=jnp.float32) * 0.1
    out4 = jax.block_until_ready(final_stage_forward(x4, w4, b4))
    assert jnp.allclose(out4, _ref(x4, w4, b4), atol=1e-5, rtol=1e-5)

    print("KERNEL_OK")
</pallas_src>

<mosaic_0001>
module attributes {stable_mosaic.version = 11 : i64} {
  func.func @_final_stage_kernel_vpu(%arg0: i32, %arg1: i32, %arg2: memref<1x4x256xf32, #tpu.memory_space<vmem>>, %arg3: memref<8x4xf32, #tpu.memory_space<vmem>>, %arg4: memref<8x1xf32, #tpu.memory_space<vmem>>, %arg5: memref<1x8x256xf32, #tpu.memory_space<vmem>>) attributes {dimension_semantics = [#tpu.dimension_semantics<parallel>, #tpu.dimension_semantics<parallel>], iteration_bounds = array<i64: 2, 1>, scalar_prefetch = 0 : i64, scratch_operands = 0 : i64, tpu.core_type = #tpu.core_type<tc>, window_params = [{transform_indices = @transform_0, window_bounds = array<i64: 1, 4, 256>}, {pipeline_mode = #tpu.pipeline_mode<synchronous>, transform_indices = @transform_1, window_bounds = array<i64: 8, 4>}, {pipeline_mode = #tpu.pipeline_mode<synchronous>, transform_indices = @transform_2, window_bounds = array<i64: 8, 1>}, {transform_indices = @transform_3, window_bounds = array<i64: 1, 8, 256>}]} {
    %c0 = arith.constant 0 : index
    %c0_0 = arith.constant 0 : index
    %0 = vector.load %arg3[%c0, %c0_0] : memref<8x4xf32, #tpu.memory_space<vmem>>, vector<8x4xf32>
    %c0_1 = arith.constant 0 : index
    %c0_2 = arith.constant 0 : index
    %1 = vector.load %arg4[%c0_1, %c0_2] : memref<8x1xf32, #tpu.memory_space<vmem>>, vector<8x1xf32>
    %c0_3 = arith.constant 0 : index
    %c0_4 = arith.constant 0 : index
    %c0_5 = arith.constant 0 : index
    %2 = vector.load %arg2[%c0_3, %c0_4, %c0_5] : memref<1x4x256xf32, #tpu.memory_space<vmem>>, vector<1x4x256xf32>
    %3 = vector.shape_cast %2 : vector<1x4x256xf32> to vector<4x256xf32>
    %cst = arith.constant 0.000000e+00 : f32
    %4 = vector.broadcast %cst : f32 to vector<4x256xf32>
    %5 = arith.maximumf %3, %4 : vector<4x256xf32>
    %6 = vector.extract_strided_slice %0 {offsets = [0, 0], sizes = [8, 1], strides = [1, 1]} : vector<8x4xf32> to vector<8x1xf32>
    %7 = vector.extract_strided_slice %5 {offsets = [0, 0], sizes = [1, 256], strides = [1, 1]} : vector<4x256xf32> to vector<1x256xf32>
    %8 = vector.broadcast %6 : vector<8x1xf32> to vector<8x256xf32>
    %9 = vector.broadcast %7 : vector<1x256xf32> to vector<8x256xf32>
    %10 = arith.mulf %8, %9 : vector<8x256xf32>
    %11 = vector.extract_strided_slice %0 {offsets = [0, 1], sizes = [8, 1], strides = [1, 1]} : vector<8x4xf32> to vector<8x1xf32>
    %12 = vector.extract_strided_slice %5 {offsets = [1, 0], sizes = [1, 256], strides = [1, 1]} : vector<4x256xf32> to vector<1x256xf32>
    %13 = vector.broadcast %11 : vector<8x1xf32> to vector<8x256xf32>
    %14 = vector.broadcast %12 : vector<1x256xf32> to vector<8x256xf32>
    %15 = arith.mulf %13, %14 : vector<8x256xf32>
    %16 = arith.addf %10, %15 : vector<8x256xf32>
    %17 = vector.extract_strided_slice %0 {offsets = [0, 2], sizes = [8, 1], strides = [1, 1]} : vector<8x4xf32> to vector<8x1xf32>
    %18 = vector.extract_strided_slice %5 {offsets = [2, 0], sizes = [1, 256], strides = [1, 1]} : vector<4x256xf32> to vector<1x256xf32>
    %19 = vector.broadcast %17 : vector<8x1xf32> to vector<8x256xf32>
    %20 = vector.broadcast %18 : vector<1x256xf32> to vector<8x256xf32>
    %21 = arith.mulf %19, %20 : vector<8x256xf32>
    %22 = arith.addf %16, %21 : vector<8x256xf32>
    %23 = vector.extract_strided_slice %0 {offsets = [0, 3], sizes = [8, 1], strides = [1, 1]} : vector<8x4xf32> to vector<8x1xf32>
    %24 = vector.extract_strided_slice %5 {offsets = [3, 0], sizes = [1, 256], strides = [1, 1]} : vector<4x256xf32> to vector<1x256xf32>
    %25 = vector.broadcast %23 : vector<8x1xf32> to vector<8x256xf32>
    %26 = vector.broadcast %24 : vector<1x256xf32> to vector<8x256xf32>
    %27 = arith.mulf %25, %26 : vector<8x256xf32>
    %28 = arith.addf %22, %27 : vector<8x256xf32>
    %29 = vector.broadcast %1 : vector<8x1xf32> to vector<8x256xf32>
    %30 = arith.addf %28, %29 : vector<8x256xf32>
    %c0_6 = arith.constant 0 : index
    %c0_7 = arith.constant 0 : index
    %c0_8 = arith.constant 0 : index
    %31 = vector.load %arg5[%c0_6, %c0_7, %c0_8] : memref<1x8x256xf32, #tpu.memory_space<vmem>>, vector<1x8x256xf32>
    %32 = vector.shape_cast %31 : vector<1x8x256xf32> to vector<8x256xf32>
    %33 = vector.shape_cast %30 : vector<8x256xf32> to vector<1x8x256xf32>
    tpu.vector_store %arg5[%c0_6, %c0_7, %c0_8], %33 {strides = array<i32>} : memref<1x8x256xf32, #tpu.memory_space<vmem>>, vector<1x8x256xf32>,
    return
  }
  func.func @transform_0(%arg0: i32, %arg1: i32) -> (i32, i32, i32) {
    %c0_i32 = arith.constant 0 : i32
    %c0_i32_0 = arith.constant 0 : i32
    return %arg0, %c0_i32, %arg1 : i32, i32, i32
  }
  func.func @transform_1(%arg0: i32, %arg1: i32) -> (i32, i32) {
    %c0_i32 = arith.constant 0 : i32
    %c0_i32_0 = arith.constant 0 : i32
    %c0_i32_1 = arith.constant 0 : i32
    return %c0_i32, %c0_i32_0 : i32, i32
  }
  func.func @transform_2(%arg0: i32, %arg1: i32) -> (i32, i32) {
    %c0_i32 = arith.constant 0 : i32
    %c0_i32_0 = arith.constant 0 : i32
    %c0_i32_1 = arith.constant 0 : i32
    return %c0_i32, %c0_i32_0 : i32, i32
  }
  func.func @transform_3(%arg0: i32, %arg1: i32) -> (i32, i32, i32) {
    %c0_i32 = arith.constant 0 : i32
    %c0_i32_0 = arith.constant 0 : i32
    return %arg0, %c0_i32, %arg1 : i32, i32, i32
  }
}

module attributes {stable_mosaic.version = 11 : i64} {
  func.func @_final_stage_kernel_vpu(%arg0: i32, %arg1: i32, %arg2: memref<1x4x256xf32, #tpu.memory_space<vmem>>, %arg3: memref<8x4xf32, #tpu.memory_space<vmem>>, %arg4: memref<8x1xf32, #tpu.memory_space<vmem>>, %arg5: memref<1x8x256xf32, #tpu.memory_space<vmem>>) attributes {dimension_semantics = [#tpu.dimension_semantics<parallel>, #tpu.dimension_semantics<parallel>], iteration_bounds = array<i64: 2, 1>, scalar_prefetch = 0 : i64, scratch_operands = 0 : i64, tpu.core_type = #tpu.core_type<tc>, window_params = [{transform_indices = @transform_0, window_bounds = array<i64: 1, 4, 256>}, {pipeline_mode = #tpu.pipeline_mode<synchronous>, transform_indices = @transform_1, window_bounds = array<i64: 8, 4>}, {pipeline_mode = #tpu.pipeline_mode<synchronous>, transform_indices = @transform_2, window_bounds = array<i64: 8, 1>}, {transform_indices = @transform_3, window_bounds = array<i64: 1, 8, 256>}]} {
    %c0 = arith.constant 0 : index
    %c0_0 = arith.constant 0 : index
    %0 = vector.load %arg3[%c0, %c0_0] : memref<8x4xf32, #tpu.memory_space<vmem>>, vector<8x4xf32>
    %c0_1 = arith.constant 0 : index
    %c0_2 = arith.constant 0 : index
    %1 = vector.load %arg4[%c0_1, %c0_2] : memref<8x1xf32, #tpu.memory_space<vmem>>, vector<8x1xf32>
    %c0_3 = arith.constant 0 : index
    %c0_4 = arith.constant 0 : index
    %c0_5 = arith.constant 0 : index
    %2 = vector.load %arg2[%c0_3, %c0_4, %c0_5] : memref<1x4x256xf32, #tpu.memory_space<vmem>>, vector<1x4x256xf32>
    %3 = vector.shape_cast %2 : vector<1x4x256xf32> to vector<4x256xf32>
    %cst = arith.constant 0.000000e+00 : f32
    %4 = vector.broadcast %cst : f32 to vector<4x256xf32>
    %5 = arith.maximumf %3, %4 : vector<4x256xf32>
    %6 = vector.extract_strided_slice %0 {offsets = [0, 0], sizes = [8, 1], strides = [1, 1]} : vector<8x4xf32> to vector<8x1xf32>
    %7 = vector.extract_strided_slice %5 {offsets = [0, 0], sizes = [1, 256], strides = [1, 1]} : vector<4x256xf32> to vector<1x256xf32>
    %8 = vector.broadcast %6 : vector<8x1xf32> to vector<8x256xf32>
    %9 = vector.broadcast %7 : vector<1x256xf32> to vector<8x256xf32>
    %10 = arith.mulf %8, %9 : vector<8x256xf32>
    %11 = vector.extract_strided_slice %0 {offsets = [0, 1], sizes = [8, 1], strides = [1, 1]} : vector<8x4xf32> to vector<8x1xf32>
    %12 = vector.extract_strided_slice %5 {offsets = [1, 0], sizes = [1, 256], strides = [1, 1]} : vector<4x256xf32> to vector<1x256xf32>
    %13 = vector.broadcast %11 : vector<8x1xf32> to vector<8x256xf32>
    %14 = vector.broadcast %12 : vector<1x256xf32> to vector<8x256xf32>
    %15 = arith.mulf %13, %14 : vector<8x256xf32>
    %16 = arith.addf %10, %15 : vector<8x256xf32>
    %17 = vector.extract_strided_slice %0 {offsets = [0, 2], sizes = [8, 1], strides = [1, 1]} : vector<8x4xf32> to vector<8x1xf32>
    %18 = vector.extract_strided_slice %5 {offsets = [2, 0], sizes = [1, 256], strides = [1, 1]} : vector<4x256xf32> to vector<1x256xf32>
    %19 = vector.broadcast %17 : vector<8x1xf32> to vector<8x256xf32>
    %20 = vector.broadcast %18 : vector<1x256xf32> to vector<8x256xf32>
    %21 = arith.mulf %19, %20 : vector<8x256xf32>
    %22 = arith.addf %16, %21 : vector<8x256xf32>
    %23 = vector.extract_strided_slice %0 {offsets = [0, 3], sizes = [8, 1], strides = [1, 1]} : vector<8x4xf32> to vector<8x1xf32>
    %24 = vector.extract_strided_slice %5 {offsets = [3, 0], sizes = [1, 256], strides = [1, 1]} : vector<4x256xf32> to vector<1x256xf32>
    %25 = vector.broadcast %23 : vector<8x1xf32> to vector<8x256xf32>
    %26 = vector.broadcast %24 : vector<1x256xf32> to vector<8x256xf32>
    %27 = arith.mulf %25, %26 : vector<8x256xf32>
    %28 = arith.addf %22, %27 : vector<8x256xf32>
    %29 = vector.broadcast %1 : vector<8x1xf32> to vector<8x256xf32>
    %30 = arith.addf %28, %29 : vector<8x256xf32>
    %c0_6 = arith.constant 0 : index
    %c0_7 = arith.constant 0 : index
    %c0_8 = arith.constant 0 : index
    %31 = vector.load %arg5[%c0_6, %c0_7, %c0_8] : memref<1x8x256xf32, #tpu.memory_space<vmem>>, vector<1x8x256xf32>
    %32 = vector.shape_cast %31 : vector<1x8x256xf32> to vector<8x256xf32>
    %33 = vector.shape_cast %30 : vector<8x256xf32> to vector<1x8x256xf32>
    tpu.vector_store %arg5[%c0_6, %c0_7, %c0_8], %33 {strides = array<i32>} : memref<1x8x256xf32, #tpu.memory_space<vmem>>, vector<1x8x256xf32>,
    return
  }
  func.func @transform_0(%arg0: i32, %arg1: i32) -> (i32, i32, i32) {
    %c0_i32 = arith.constant 0 : i32
    %c0_i32_0 = arith.constant 0 : i32
    return %arg0, %c0_i32, %arg1 : i32, i32, i32
  }
  func.func @transform_1(%arg0: i32, %arg1: i32) -> (i32, i32) {
    %c0_i32 = arith.constant 0 : i32
    %c0_i32_0 = arith.constant 0 : i32
    %c0_i32_1 = arith.constant 0 : i32
    return %c0_i32, %c0_i32_0 : i32, i32
  }
  func.func @transform_2(%arg0: i32, %arg1: i32) -> (i32, i32) {
    %c0_i32 = arith.constant 0 : i32
    %c0_i32_0 = arith.constant 0 : i32
    %c0_i32_1 = arith.constant 0 : i32
    return %c0_i32, %c0_i32_0 : i32, i32
  }
  func.func @transform_3(%arg0: i32, %arg1: i32) -> (i32, i32, i32) {
    %c0_i32 = arith.constant 0 : i32
    %c0_i32_0 = arith.constant 0 : i32
    return %arg0, %c0_i32, %arg1 : i32, i32, i32
  }
}

</mosaic_0001>

<bundles_post_ra>
// kernel: tpu_custom_call.1
= control target key start
LH: loop header
LB: loop body
LE: loop exit
PB: predicated region body
PF: predicated region fallthrough
CT: control target
= control target key end

     0   :  { %8 = vsyncpa [#allocation3], 0  ;;  %s655_s0 = inlined_call_operand.vmem [shape: f32[2,4,256], index: 0, kind: input, shape index: {}]   ;;  %s656_s1 = inlined_call_operand.vmem [shape: f32[8,4], index: 1, kind: input, shape index: {}]   ;;  %s657_s2 = inlined_call_operand.vmem [shape: f32[8,1], index: 2, kind: input, shape index: {}]   ;;  %s658_s3 = inlined_call_operand.hbm [shape: f32[2,8,256], index: 3, kind: output, shape index: {}]  }
   0x1   :  { %10 = vsyncpa [#allocation3 + $0x1], 0  ;;  %s548_s12 = smov 0   ;;  %s550_s13 = smov 0  }
   0x2   :  { %s552_s14 = smov 0   ;;  %s554_s15 = smov 0  }
   0x3   :  { %s556_s16 = smov 0   ;;  %s558_s17 = smov 0  }
   0x4 LB: > { %s364_s18 = sadd.s32 4294967295, %s522_s17   ;;  %s365_s19 = sadd.s32 4294967294, %s522_s17   ;;  %s522_s17 = sphi %s558_s17, %s16_s17   ;;  %s518_s16 = sphi %s556_s16, %s665_s16   ;;  %s514_s15 = sphi %s554_s15, %s664_s15   ;;  %s510_s14 = sphi %s552_s14, %s663_s14   ;;  %s506_s13 = sphi %s550_s13, %s662_s13   ;;  %s502_s12 = sphi %s548_s12, %s661_s12  }
   0x5   : > { %s28_s20 = sadd.s32 1, %s518_s16  ;;  %s107_s21 = sadd.s32 1, %s510_s14 }
   0x6   : > { %p30_p0 = scmp.ge.s32.totalorder %s28_s20, 2  ;;  %p117_p1 = scmp.ne.s32.totalorder %s510_s14, %s506_s13 }
   0x7   : > { %p118_p2 = scmp.eq.s32.totalorder %s364_s18, 1  ;;  %p123_p3 = scmp.ne.s32.totalorder %s506_s13, %s502_s12 }
   0x8   : > { %s667_s20 = smov (%p30_p0, %s28_s20), 0  ;;  %p124_p5 = scmp.eq.s32.totalorder %s365_s19, 1 }
   0x9   : > { %p588_p4 = por %p118_p2, %p117_p1  ;;  %s102_s23 = ssub.s32 %s518_s16, %s667_s20 }
   0xa   : > { %p368_p6 = scmp.ge.s32.totalorder %s522_s17, 1  ;;  %p105_p7 = scmp.eq.s32.totalorder %s102_s23, 0 }
   0xb   : > { %p595_p8 = por %p124_p5, %p123_p3  ;;  %p161_p9 = scmp.lt.s32.totalorder %s522_s17, 3 }
   0xc   : > { %s601_s25 = scalar_select %p105_p7, %s510_s14, %s107_s21  }
   0xd   : > { %p162_p10 = pnand %p368_p6, %p161_p9 }
   0xe   : > { %p190_p11 = scmp.lt.s32.totalorder (!%p162_p10), %s514_s15, 1  ;;  %s186_s8 = sand.u32 (!%p162_p10), 1, %s506_s13  }
   0xf   : > { %165 = sbr.rel (%p162_p10) target bundleno = 160 (0xa0), region = 32  ;;  %s369_s9 = sshll.u32 (!%p162_p10), %s186_s8, 4 }
  0x10   : > { %s378_s10 = sshll.u32 (!%p162_p10), %s514_s15, 4  ;;  %s188_s21 = scalar_lea.vmem (!%p162_p10), [#allocation2], %s369_s9 }
  0x11   : > { %s283_s19 = scalar_lea.hbm (!%p162_p10), %s658_s3, %s378_s10  ;;  %s285_s23 = sshll.u32 (!%p162_p10), %s188_s21, 4  ;;  %s286_s23 = int_to_ptr.vmem [resolvable:$true] %s285_s23 }
  0x12   : > { %s270_s26 = scalar_lea.sflag (!%p162_p10), [#allocation3], %s186_s8 }
  0x14   : > { %v200_v0 = vld [vmem:[%s656_s1] sm:$0xff]  ;;  %v524_v1 = vmov 0   ;;  %v525_v2 = vmov 2   ;;  %v526_v4 = vmov 1   ;;  %v527_v5 = vmov 3   ;;  %s191_s30 = scalar_select %p190_p11, %s514_s15, 1 }
  0x15   : > { %438 = vset.pattern.permute.xlu0 %v524_v1  ;;  %440 = vset.pattern.permute.xlu1 %v525_v2  ;;  %v201_v3 = vld [vmem:[%s657_s2] sm:$0xff]  ;;  %s287_s15 = sshll.u32 %s283_s19, 4  ;;  %s288_s15 = int_to_ptr.hbm [resolvable:$true] %s287_s15 }
  0x16   : > { %206 = vperm.xlu0 %438, %v200_v0   ;;  %233 = vperm.xlu1 %440, %v200_v0   ;;  %s377_s4 = sshll.u32 %s191_s30, 3  ;;  %s458_s27 = sshra.s32 %s288_s15, 4  ;;  %s459_s27 = int_to_ptr.hbm [resolvable:$true] %s458_s27 }
  0x17   : > { %442 = vset.pattern.permute.xlu2 %v524_v1  ;;  %s197_s7 = scalar_lea.vmem %s655_s0, %s377_s4  ;;  %s460_s28 = scalar_lea.hbm %s459_s27, 16 }
  0x18   : > { %262 = vperm.xlu2 %442, %v201_v3   ;;  %v202_v6 = vld [vmem:[%s197_s7] sm:$0xff]  ;;  %p461_p12 = scmp.ne.s32.totalorder %s459_s27, %s460_s28  ;;  %s464_s4 = scalar_lea.hbm %s658_s3, 32 }
  0x19   : > { %v203_v7 = vmax.f32 %v202_v6, 0.0  ;;  %p465_p1 = scmp.lt.s32.totalorder %s459_s27, %s658_s3  ;;  %p466_p2 = scmp.lt.s32.totalorder %s464_s4, %s460_s28 }
  0x1a   : > { %p462_p13 = pnand %p461_p12, %p588_p4 }
  0x1b   : > { %v210_v10 = vperm.slane %v203_v7, 0  ;;  %v211_v11 = vperm.slane %v203_v7, 4  ;;  %v222_v12 = vperm.slane %v203_v7, 1  ;;  %v223_v13 = vperm.slane %v203_v7, 5  ;;  %p467_p3 = por %p466_p2, %p465_p1 }
  0x1c   : > { %v236_v14 = vperm.slane %v203_v7, 2  ;;  %v237_v15 = vperm.slane %v203_v7, 6  ;;  %v250_v16 = vperm.slane %v203_v7, 3  ;;  %v251_v17 = vperm.slane %v203_v7, 7  ;;  %p463_p0 = pneg %p462_p13 }
  0x1d   : > { %v214_v18 = vperm.slane %v210_v10, 0  ;;  %v215_v19 = vperm.slane %v211_v11, 0  ;;  %v226_v20 = vperm.slane %v222_v12, 1  ;;  %v227_v21 = vperm.slane %v223_v13, 1 }
  0x1e   : > { %439 = vset.pattern.permute.xlu0 %v526_v4  ;;  %441 = vset.pattern.permute.xlu1 %v527_v5  ;;  %v240_v22 = vperm.slane %v236_v14, 2  ;;  %v241_v23 = vperm.slane %v237_v15, 2  ;;  %v254_v24 = vperm.slane %v250_v16, 3  ;;  %v255_v25 = vperm.slane %v251_v17, 3  ;;  %p468_p5 = pnand %p467_p3, %p463_p0 }
  0x1f   : > { %219 = vperm.xlu0 %439, %v200_v0   ;;  %247 = vperm.xlu1 %441, %v200_v0  }
  0x27   : > { %443 = vset.pattern.permute.xlu0 %v524_v1 }
  0x72   : > { %v263_v40 = vpop.permute.xlu2 %262 }
  0x88   : > { %v207_v8 = vpop.permute.xlu0 %206  ;;  %v234_v9 = vpop.permute.xlu1 %233 }
  0x89   : > { %v216_v28 = vmul.f32 %v214_v18, %v207_v8  ;;  %v217_v29 = vmul.f32 %v215_v19, %v207_v8  ;;  %v242_v32 = vmul.f32 %v240_v22, %v234_v9  ;;  %v243_v33 = vmul.f32 %v241_v23, %v234_v9 }
  0x91   : > { %v220_v26 = vpop.permute.xlu0 %219  ;;  %v248_v27 = vpop.permute.xlu1 %247 }
  0x92   : > { %v228_v30 = vmul.f32 %v226_v20, %v220_v26  ;;  %v229_v31 = vmul.f32 %v227_v21, %v220_v26  ;;  %v256_v36 = vmul.f32 %v254_v24, %v248_v27  ;;  %v257_v37 = vmul.f32 %v255_v25, %v248_v27 }
  0x94   : > { %v230_v34 = vadd.f32 %v228_v30, %v216_v28  ;;  %v231_v35 = vadd.f32 %v229_v31, %v217_v29 }
  0x96   : > { %v244_v38 = vadd.f32 %v242_v32, %v230_v34  ;;  %v245_v39 = vadd.f32 %v243_v33, %v231_v35 }
  0x98   : > { %v258_v41 = vadd.f32 %v256_v36, %v244_v38  ;;  %v259_v42 = vadd.f32 %v257_v37, %v245_v39 }
  0x9a   : > { %v265_v43 = vadd.f32 %v263_v40, %v258_v41  ;;  %v266_v44 = vadd.f32 %v263_v40, %v259_v42 }
  0x9c   : > { %267 = vst [vmem:[%s188_s21] sm:$0xff] %v265_v43 }
  0x9d   : > { %268 = vst [vmem:[%s188_s21 + $0x8] sm:$0xff] %v266_v44 }
  0x9e   : > { %471 = shalt.err (!%p468_p5)
}
  0x9f   : > { %379 = dma.vmem_to_hbm [thread:$0]  (%p588_p4), %s286_s23, 256, %s288_s15, %s270_s26  }
  0xa0 PF: > { %p385_p6 = scmp.ge.s32.totalorder %s522_s17, 2  ;;  %s299_s7 = sand.u32 1, %s502_s12  }
  0xa1   : > { %s300_s8 = scalar_lea.sflag [#allocation3], %s299_s7 }
  0xa2   : > { %p382_p7 = pnand %p385_p6, %p595_p8 }
  0xa4   : > { %p383_p9 = pneg %p382_p7 }
  0xa6   : > { %497 = dma.done.wait (%p383_p9), %s300_s8, 256  }
  0xa7   : > { %499 = vsyncadd (%p383_p9), %s300_s8, 4294967040  ;;  %s16_s17 = sadd.s32 1, %s522_s17   ;;  %s661_s12 = smov %s506_s13 }
  0xa8   : > { %p13_p10 = scmp.ge.s32.totalorder %s16_s17, 4   ;;  %s662_s13 = smov %s510_s14 }
  0xa9   : > { %s663_s14 = smov %s601_s25  ;;  %s664_s15 = smov %s518_s16 }
  0xaa   : > { %s665_s16 = smov %s667_s20  ;;  %15 = sbr.rel (!%p13_p10) target bundleno = 4 (0x4), region = 67 }
  0xaf   :  { %306 = vsyncpa [#allocation3], 1 }
  0xb0   :  { %308 = vsyncpa [#allocation3 + $0x1], 1 }

// kernel: tpu_custom_call.1
= control target key start
LH: loop header
LB: loop body
LE: loop exit
PB: predicated region body
PF: predicated region fallthrough
CT: control target
= control target key end

     0   :  { %8 = vsyncpa [#allocation3], 0  ;;  %s655_s0 = inlined_call_operand.vmem [shape: f32[2,4,256], index: 0, kind: input, shape index: {}]   ;;  %s656_s1 = inlined_call_operand.vmem [shape: f32[8,4], index: 1, kind: input, shape index: {}]   ;;  %s657_s2 = inlined_call_operand.vmem [shape: f32[8,1], index: 2, kind: input, shape index: {}]   ;;  %s658_s3 = inlined_call_operand.hbm [shape: f32[2,8,256], index: 3, kind: output, shape index: {}]  }
   0x1   :  { %10 = vsyncpa [#allocation3 + $0x1], 0  ;;  %s548_s12 = smov 0   ;;  %s550_s13 = smov 0  }
   0x2   :  { %s552_s14 = smov 0   ;;  %s554_s15 = smov 0  }
   0x3   :  { %s556_s16 = smov 0   ;;  %s558_s17 = smov 0  }
   0x4 LB: > { %s364_s18 = sadd.s32 4294967295, %s522_s17   ;;  %s365_s19 = sadd.s32 4294967294, %s522_s17   ;;  %s522_s17 = sphi %s558_s17, %s16_s17   ;;  %s518_s16 = sphi %s556_s16, %s665_s16   ;;  %s514_s15 = sphi %s554_s15, %s664_s15   ;;  %s510_s14 = sphi %s552_s14, %s663_s14   ;;  %s506_s13 = sphi %s550_s13, %s662_s13   ;;  %s502_s12 = sphi %s548_s12, %s661_s12  }
   0x5   : > { %s28_s20 = sadd.s32 1, %s518_s16  ;;  %s107_s21 = sadd.s32 1, %s510_s14 }
   0x6   : > { %p30_p0 = scmp.ge.s32.totalorder %s28_s20, 2  ;;  %p117_p1 = scmp.ne.s32.totalorder %s510_s14, %s506_s13 }
   0x7   : > { %p118_p2 = scmp.eq.s32.totalorder %s364_s18, 1  ;;  %p123_p3 = scmp.ne.s32.totalorder %s506_s13, %s502_s12 }
   0x8   : > { %s667_s20 = smov (%p30_p0, %s28_s20), 0  ;;  %p124_p5 = scmp.eq.s32.totalorder %s365_s19, 1 }
   0x9   : > { %p588_p4 = por %p118_p2, %p117_p1  ;;  %s102_s23 = ssub.s32 %s518_s16, %s667_s20 }
   0xa   : > { %p368_p6 = scmp.ge.s32.totalorder %s522_s17, 1  ;;  %p105_p7 = scmp.eq.s32.totalorder %s102_s23, 0 }
   0xb   : > { %p595_p8 = por %p124_p5, %p123_p3  ;;  %p161_p9 = scmp.lt.s32.totalorder %s522_s17, 3 }
   0xc   : > { %s601_s25 = scalar_select %p105_p7, %s510_s14, %s107_s21  }
   0xd   : > { %p162_p10 = pnand %p368_p6, %p161_p9 }
   0xe   : > { %p190_p11 = scmp.lt.s32.totalorder (!%p162_p10), %s514_s15, 1  ;;  %s186_s8 = sand.u32 (!%p162_p10), 1, %s506_s13  }
   0xf   : > { %165 = sbr.rel (%p162_p10) target bundleno = 160 (0xa0), region = 32  ;;  %s369_s9 = sshll.u32 (!%p162_p10), %s186_s8, 4 }
  0x10   : > { %s378_s10 = sshll.u32 (!%p162_p10), %s514_s15, 4  ;;  %s188_s21 = scalar_lea.vmem (!%p162_p10), [#allocation2], %s369_s9 }
  0x11   : > { %s283_s19 = scalar_lea.hbm (!%p162_p10), %s658_s3, %s378_s10  ;;  %s285_s23 = sshll.u32 (!%p162_p10), %s188_s21, 4  ;;  %s286_s23 = int_to_ptr.vmem [resolvable:$true] %s285_s23 }
  0x12   : > { %s270_s26 = scalar_lea.sflag (!%p162_p10), [#allocation3], %s186_s8 }
  0x14   : > { %v200_v0 = vld [vmem:[%s656_s1] sm:$0xff]  ;;  %v524_v1 = vmov 0   ;;  %v525_v2 = vmov 2   ;;  %v526_v4 = vmov 1   ;;  %v527_v5 = vmov 3   ;;  %s191_s30 = scalar_select %p190_p11, %s514_s15, 1 }
  0x15   : > { %438 = vset.pattern.permute.xlu0 %v524_v1  ;;  %440 = vset.pattern.permute.xlu1 %v525_v2  ;;  %v201_v3 = vld [vmem:[%s657_s2] sm:$0xff]  ;;  %s287_s15 = sshll.u32 %s283_s19, 4  ;;  %s288_s15 = int_to_ptr.hbm [resolvable:$true] %s287_s15 }
  0x16   : > { %206 = vperm.xlu0 %438, %v200_v0   ;;  %233 = vperm.xlu1 %440, %v200_v0   ;;  %s377_s4 = sshll.u32 %s191_s30, 3  ;;  %s458_s27 = sshra.s32 %s288_s15, 4  ;;  %s459_s27 = int_to_ptr.hbm [resolvable:$true] %s458_s27 }
  0x17   : > { %442 = vset.pattern.permute.xlu2 %v524_v1  ;;  %s197_s7 = scalar_lea.vmem %s655_s0, %s377_s4  ;;  %s460_s28 = scalar_lea.hbm %s459_s27, 16 }
  0x18   : > { %262 = vperm.xlu2 %442, %v201_v3   ;;  %v202_v6 = vld [vmem:[%s197_s7] sm:$0xff]  ;;  %p461_p12 = scmp.ne.s32.totalorder %s459_s27, %s460_s28  ;;  %s464_s4 = scalar_lea.hbm %s658_s3, 32 }
  0x19   : > { %v203_v7 = vmax.f32 %v202_v6, 0.0  ;;  %p465_p1 = scmp.lt.s32.totalorder %s459_s27, %s658_s3  ;;  %p466_p2 = scmp.lt.s32.totalorder %s464_s4, %s460_s28 }
  0x1a   : > { %p462_p13 = pnand %p461_p12, %p588_p4 }
  0x1b   : > { %v210_v10 = vperm.slane %v203_v7, 0  ;;  %v211_v11 = vperm.slane %v203_v7, 4  ;;  %v222_v12 = vperm.slane %v203_v7, 1  ;;  %v223_v13 = vperm.slane %v203_v7, 5  ;;  %p467_p3 = por %p466_p2, %p465_p1 }
  0x1c   : > { %v236_v14 = vperm.slane %v203_v7, 2  ;;  %v237_v15 = vperm.slane %v203_v7, 6  ;;  %v250_v16 = vperm.slane %v203_v7, 3  ;;  %v251_v17 = vperm.slane %v203_v7, 7  ;;  %p463_p0 = pneg %p462_p13 }
  0x1d   : > { %v214_v18 = vperm.slane %v210_v10, 0  ;;  %v215_v19 = vperm.slane %v211_v11, 0  ;;  %v226_v20 = vperm.slane %v222_v12, 1  ;;  %v227_v21 = vperm.slane %v223_v13, 1 }
  0x1e   : > { %439 = vset.pattern.permute.xlu0 %v526_v4  ;;  %441 = vset.pattern.permute.xlu1 %v527_v5  ;;  %v240_v22 = vperm.slane %v236_v14, 2  ;;  %v241_v23 = vperm.slane %v237_v15, 2  ;;  %v254_v24 = vperm.slane %v250_v16, 3  ;;  %v255_v25 = vperm.slane %v251_v17, 3  ;;  %p468_p5 = pnand %p467_p3, %p463_p0 }
  0x1f   : > { %219 = vperm.xlu0 %439, %v200_v0   ;;  %247 = vperm.xlu1 %441, %v200_v0  }
  0x27   : > { %443 = vset.pattern.permute.xlu0 %v524_v1 }
  0x72   : > { %v263_v40 = vpop.permute.xlu2 %262 }
  0x88   : > { %v207_v8 = vpop.permute.xlu0 %206  ;;  %v234_v9 = vpop.permute.xlu1 %233 }
  0x89   : > { %v216_v28 = vmul.f32 %v214_v18, %v207_v8  ;;  %v217_v29 = vmul.f32 %v215_v19, %v207_v8  ;;  %v242_v32 = vmul.f32 %v240_v22, %v234_v9  ;;  %v243_v33 = vmul.f32 %v241_v23, %v234_v9 }
  0x91   : > { %v220_v26 = vpop.permute.xlu0 %219  ;;  %v248_v27 = vpop.permute.xlu1 %247 }
  0x92   : > { %v228_v30 = vmul.f32 %v226_v20, %v220_v26  ;;  %v229_v31 = vmul.f32 %v227_v21, %v220_v26  ;;  %v256_v36 = vmul.f32 %v254_v24, %v248_v27  ;;  %v257_v37 = vmul.f32 %v255_v25, %v248_v27 }
  0x94   : > { %v230_v34 = vadd.f32 %v228_v30, %v216_v28  ;;  %v231_v35 = vadd.f32 %v229_v31, %v217_v29 }
  0x96   : > { %v244_v38 = vadd.f32 %v242_v32, %v230_v34  ;;  %v245_v39 = vadd.f32 %v243_v33, %v231_v35 }
  0x98   : > { %v258_v41 = vadd.f32 %v256_v36, %v244_v38  ;;  %v259_v42 = vadd.f32 %v257_v37, %v245_v39 }
  0x9a   : > { %v265_v43 = vadd.f32 %v263_v40, %v258_v41  ;;  %v266_v44 = vadd.f32 %v263_v40, %v259_v42 }
  0x9c   : > { %267 = vst [vmem:[%s188_s21] sm:$0xff] %v265_v43 }
  0x9d   : > { %268 = vst [vmem:[%s188_s21 + $0x8] sm:$0xff] %v266_v44 }
  0x9e   : > { %471 = shalt.err (!%p468_p5)
}
  0x9f   : > { %379 = dma.vmem_to_hbm [thread:$0]  (%p588_p4), %s286_s23, 256, %s288_s15, %s270_s26  }
  0xa0 PF: > { %p385_p6 = scmp.ge.s32.totalorder %s522_s17, 2  ;;  %s299_s7 = sand.u32 1, %s502_s12  }
  0xa1   : > { %s300_s8 = scalar_lea.sflag [#allocation3], %s299_s7 }
  0xa2   : > { %p382_p7 = pnand %p385_p6, %p595_p8 }
  0xa4   : > { %p383_p9 = pneg %p382_p7 }
  0xa6   : > { %497 = dma.done.wait (%p383_p9), %s300_s8, 256  }
  0xa7   : > { %499 = vsyncadd (%p383_p9), %s300_s8, 4294967040  ;;  %s16_s17 = sadd.s32 1, %s522_s17   ;;  %s661_s12 = smov %s506_s13 }
  0xa8   : > { %p13_p10 = scmp.ge.s32.totalorder %s16_s17, 4   ;;  %s662_s13 = smov %s510_s14 }
  0xa9   : > { %s663_s14 = smov %s601_s25  ;;  %s664_s15 = smov %s518_s16 }
  0xaa   : > { %s665_s16 = smov %s667_s20  ;;  %15 = sbr.rel (!%p13_p10) target bundleno = 4 (0x4), region = 67 }
  0xaf   :  { %306 = vsyncpa [#allocation3], 1 }
  0xb0   :  { %308 = vsyncpa [#allocation3 + $0x1], 1 }

</bundles_post_ra>
